<compile_context>
chip_gen: v7x
topology: tpu7x:2x2x1
jax: 0.10.0
libtpu: 0.0.40
codegen_flags: <defaults>
</compile_context>

<pallas_src>
import functools

import jax
import jax.numpy as jnp
from jax.experimental import pallas as pl
from jax.experimental.pallas import tpu as pltpu


def _log_softmax_kernel(x_ref, o_ref, *, inv_temperature):
    # x_ref: (1, C, tile) block in VMEM; reduce over axis 1 (channels).
    x = x_ref[...].astype(jnp.float32) * inv_temperature
    m = jnp.max(x, axis=1, keepdims=True)                      # (1, 1, tile)
    s = x - m                                                  # stable shift
    lse = jnp.log(jnp.sum(jnp.exp(s), axis=1, keepdims=True))  # (1, 1, tile)
    o_ref[...] = (s - lse).astype(o_ref.dtype)


def softmax_t(x, temperature, *, max_lane_tile=1024,
              vmem_block_budget=8 * 1024 * 1024):
    """log_softmax(x / temperature, dim=1) for NCHW input x."""
    n, c, h, w = x.shape
    hw = h * w
    itemsize = jnp.dtype(x.dtype).itemsize

    # --- VMEM accounting for one (1, C, lane_tile) block ---------------------
    # Channels sit on the sublane axis -> round C up to the packing granule.
    sublane = {4: 8, 2: 16, 1: 32}.get(itemsize, 8)
    c_pad = pl.cdiv(c, sublane) * sublane
    # 2x double-buffered input + 2x double-buffered output (input dtype)
    # plus ~3 block-sized f32 temporaries (upcast x, exp(s), result).
    bytes_per_col = c_pad * (4 * itemsize + 3 * 4)
    max_cols_by_vmem = (vmem_block_budget // bytes_per_col) // 128 * 128
    if max_cols_by_vmem < 128:
        # TODO(synk): online-LSE fallback (block C on a third "arbitrary" grid
        # axis with running max / log-sum-exp scratch) for vocab-sized C.
        raise ValueError(
            f"C={c} too large for a single (1, C, 128) VMEM block "
            f"(~{bytes_per_col * 128} bytes > {vmem_block_budget} budget)")

    # --- lane-tile selection --------------------------------------------------
    lane_tile = min(max_lane_tile, max_cols_by_vmem)
    # Keep both v7x TensorCores fed: aim for >= 4 total grid steps when the
    # batch dimension alone cannot provide them.
    min_steps = 4
    if n < min_steps and hw > 128:
        want_blocks = min(pl.cdiv(min_steps, n), hw // 128)
        if want_blocks > 1:
            split_tile = pl.cdiv(pl.cdiv(hw, want_blocks), 128) * 128
            lane_tile = min(lane_tile, split_tile)
    if lane_tile >= hw:
        # Whole-row block: one fully contiguous DMA per batch element.
        lane_tile = hw
    num_lane_blocks = pl.cdiv(hw, lane_tile)

    x3 = x.reshape(n, c, hw)
    kernel = functools.partial(
        _log_softmax_kernel, inv_temperature=1.0 / float(temperature))

    out3 = pl.pallas_call(
        kernel,
        out_shape=jax.ShapeDtypeStruct((n, c, hw), x.dtype),
        grid_spec=pltpu.PrefetchScalarGridSpec(
            num_scalar_prefetch=0,
            grid=(n, num_lane_blocks),
            in_specs=[pl.BlockSpec((1, c, lane_tile), lambda b, i: (b, 0, i))],
            out_specs=pl.BlockSpec((1, c, lane_tile), lambda b, i: (b, 0, i)),
        ),
        compiler_params=pltpu.CompilerParams(
            dimension_semantics=("parallel", "parallel"),
            # Raise v5e's 16 MiB scoped default; still safe on v7x (64 MiB
            # physical) since the per-step footprint is budgeted at <= 8 MiB.
            vmem_limit_bytes=32 * 1024 * 1024,
        ),
    )(x3)

    return out3.reshape(n, c, h, w)


def _reference(x, temperature):
    return jax.nn.log_softmax(x / temperature, axis=1)


if __name__ == "__main__":
    key = jax.random.PRNGKey(0)
    x = jax.random.normal(key, (2, 4, 16, 16), dtype=jnp.float32)
    temperature = 2.5

    out = jax.block_until_ready(softmax_t(x, temperature))
    ref = _reference(x, temperature)

    assert out.shape == x.shape and out.dtype == x.dtype
    assert jnp.allclose(out, ref, atol=1e-5, rtol=1e-5), "mismatch vs reference"
    print("KERNEL_OK")
</pallas_src>

<mosaic_0001>
module attributes {stable_mosaic.version = 11 : i64} {
  func.func @_log_softmax_kernel(%arg0: i32, %arg1: i32, %arg2: memref<1x4x128xf32, #tpu.memory_space<vmem>>, %arg3: memref<1x4x128xf32, #tpu.memory_space<vmem>>) attributes {dimension_semantics = [#tpu.dimension_semantics<parallel>, #tpu.dimension_semantics<parallel>], iteration_bounds = array<i64: 2, 2>, scalar_prefetch = 0 : i64, scratch_operands = 0 : i64, tpu.core_type = #tpu.core_type<tc>, window_params = [{transform_indices = @transform_0, window_bounds = array<i64: 1, 4, 128>}, {transform_indices = @transform_1, window_bounds = array<i64: 1, 4, 128>}]} {
    %c0 = arith.constant 0 : index
    %c0_0 = arith.constant 0 : index
    %c0_1 = arith.constant 0 : index
    %0 = vector.load %arg2[%c0, %c0_0, %c0_1] : memref<1x4x128xf32, #tpu.memory_space<vmem>>, vector<1x4x128xf32>
    %cst = arith.constant 4.000000e-01 : f32
    %1 = vector.broadcast %cst : f32 to vector<1x4x128xf32>
    %2 = arith.mulf %0, %1 : vector<1x4x128xf32>
    %cst_2 = arith.constant dense<0xFF800000> : vector<1x128xf32>
    %3 = vector.multi_reduction <maximumf>, %2, %cst_2 [1] : vector<1x4x128xf32> to vector<1x128xf32>
    %4 = vector.shape_cast %3 : vector<1x128xf32> to vector<1x1x128xf32>
    %5 = vector.broadcast %4 : vector<1x1x128xf32> to vector<1x4x128xf32>
    %6 = arith.subf %2, %5 : vector<1x4x128xf32>
    %7 = math.exp %6 : vector<1x4x128xf32>
    %cst_3 = arith.constant dense<0.000000e+00> : vector<1x128xf32>
    %8 = vector.multi_reduction <add>, %7, %cst_3 [1] : vector<1x4x128xf32> to vector<1x128xf32>
    %9 = vector.shape_cast %8 : vector<1x128xf32> to vector<1x1x128xf32>
    %10 = math.log %9 : vector<1x1x128xf32>
    %11 = vector.broadcast %10 : vector<1x1x128xf32> to vector<1x4x128xf32>
    %12 = arith.subf %6, %11 : vector<1x4x128xf32>
    %c0_4 = arith.constant 0 : index
    %c0_5 = arith.constant 0 : index
    %c0_6 = arith.constant 0 : index
    %13 = vector.load %arg3[%c0_4, %c0_5, %c0_6] : memref<1x4x128xf32, #tpu.memory_space<vmem>>, vector<1x4x128xf32>
    tpu.vector_store %arg3[%c0_4, %c0_5, %c0_6], %12 {strides = array<i32>} : memref<1x4x128xf32, #tpu.memory_space<vmem>>, vector<1x4x128xf32>,
    return
  }
  func.func @transform_0(%arg0: i32, %arg1: i32) -> (i32, i32, i32) {
    %c0_i32 = arith.constant 0 : i32
    %c0_i32_0 = arith.constant 0 : i32
    return %arg0, %c0_i32, %arg1 : i32, i32, i32
  }
  func.func @transform_1(%arg0: i32, %arg1: i32) -> (i32, i32, i32) {
    %c0_i32 = arith.constant 0 : i32
    %c0_i32_0 = arith.constant 0 : i32
    return %arg0, %c0_i32, %arg1 : i32, i32, i32
  }
}

</mosaic_0001>

<bundles_post_ra>
// kernel: tpu_custom_call.1
= control target key start
LH: loop header
LB: loop body
LE: loop exit
PB: predicated region body
PF: predicated region fallthrough
CT: control target
= control target key end

     0   :  { %6 = vsyncpa [#allocation3], 0  ;;  %s712_s0 = inlined_call_operand.hbm [shape: f32[2,4,256], index: 0, kind: input, shape index: {}]   ;;  %s713_s1 = inlined_call_operand.hbm [shape: f32[2,4,256], index: 1, kind: output, shape index: {}]  }
   0x1   :  { %8 = vsyncpa [#allocation3 + $0x1], 0 }
   0x2   :  { %9 = vsyncpa [#allocation4], 0 }
   0x3   :  { %11 = vsyncpa [#allocation4 + $0x1], 0  ;;  %s514_s6 = smov 0   ;;  %s516_s7 = smov 0  }
   0x4   :  { %s518_s8 = smov 0   ;;  %s520_s9 = smov 0  }
   0x5   :  { %s522_s10 = smov 0   ;;  %s524_s11 = smov 0  }
   0x6   :  { %s526_s12 = smov 0   ;;  %s528_s13 = smov 0  }
   0x7 LB: > { %s275_s14 = sadd.s32 4294967295, %s500_s13   ;;  %s276_s15 = sadd.s32 4294967294, %s500_s13   ;;  %s500_s13 = sphi %s528_s13, %s17_s13   ;;  %s496_s12 = sphi %s526_s12, %s730_s12   ;;  %s492_s11 = sphi %s524_s11, %s729_s11   ;;  %s488_s10 = sphi %s522_s10, %s728_s10   ;;  %s484_s9 = sphi %s520_s9, %s727_s9   ;;  %s480_s8 = sphi %s518_s8, %s726_s8   ;;  %s476_s7 = sphi %s516_s7, %s725_s7   ;;  %s472_s6 = sphi %s514_s6, %s724_s6  }
   0x8   : > { %s26_s16 = sadd.s32 1, %s492_s11  ;;  %s29_s17 = sadd.s32 1, %s496_s12 }
   0x9   : > { %p27_p0 = scmp.ge.s32.totalorder %s26_s16, 2  ;;  %s38_s18 = sadd.s32 1, %s480_s8 }
   0xa   : > { %p45_p1 = scmp.ne.s32.totalorder %s480_s8, %s476_s7  ;;  %p46_p2 = scmp.eq.s32.totalorder %s500_s13, 0 }
   0xb   : > { %s732_s16 = smov (%p27_p0, %s26_s16), 0  ;;  %s734_s17 = smov (!%p27_p0, %s29_s17), %s496_s12 }
   0xc   : > { %s34_s19 = ssub.s32 %s492_s11, %s732_s16  ;;  %p567_p3 = por %p46_p2, %p45_p1 }
   0xd   : > { %p31_p4 = scmp.ge.s32.totalorder %s734_s17, 2  ;;  %p51_p5 = scmp.ne.s32.totalorder %s476_s7, %s472_s6 }
   0xe   : > { %p52_p6 = scmp.eq.s32.totalorder %s275_s14, 0  ;;  %p77_p7 = scmp.eq.s32.totalorder %s275_s14, 3 }
   0xf   : > { %s736_s17 = smov (%p31_p4, %s734_s17), 0  ;;  %p83_p10 = scmp.eq.s32.totalorder %s276_s15, 3 }
  0x10   : > { %p575_p8 = por %p52_p6, %p51_p5  ;;  %p579_p9 = por %p77_p7, %p45_p1 }
  0x11   : > { %s33_s23 = ssub.s32 %s496_s12, %s736_s17  ;;  %p585_p12 = por %p83_p10, %p51_p5 }
  0x12   : > { %s717_s22 = scalar_select %p579_p9, 1, 0 }
  0x13   : > { %s35_s24 = sor.u32 %s34_s19, %s33_s23  ;;  %p302_p13 = scmp.lt.s32.totalorder %s500_s13, 4 }
  0x14   : > { %p36_p11 = scmp.eq.s32.totalorder %s35_s24, 0  ;;  %s103_s26 = sand.u32 1, %s480_s8  }
  0x15   : > { %s718_s25 = scalar_select %p585_p12, 1, 0 }
  0x16   : > { %s592_s27 = scalar_select %p36_p11, %s480_s8, %s38_s18  }
  0x17   : > { %s279_s28 = sshll.u32 %s103_s26, 2  ;;  %s280_s29 = sshll.u32 %s496_s12, 1 }
  0x18   : > { %s112_s30 = sadd.s32 %s492_s11, %s280_s29  ;;  %s107_s2 = scalar_lea.vmem [#allocation2], %s279_s28 }
  0x19   : > { %s116_s3 = sshll.u32 %s107_s2, 4  ;;  %s281_s4 = sshll.u32 %s112_s30, 6  ;;  %s596_s3 = int_to_ptr.vmem [resolvable:$true] %s116_s3 }
  0x1a   : > { %s601_s15 = scalar_lea.hbm %s712_s0, %s281_s4  ;;  %p605_p0 = pnand %p302_p13, %p567_p3 }
  0x1b   : > { %s104_s19 = scalar_lea.sflag [#allocation3], %s103_s26  ;;  %s372_s23 = scalar_lea.hbm %s601_s15, 64 }
  0x1c   : > { %p373_p4 = scmp.ne.s32.totalorder %s601_s15, %s372_s23  ;;  %p374_p5 = pneg %p605_p0 }
  0x1d   : > { %s377_s28 = scalar_lea.hbm %s712_s0, 256  ;;  %p378_p3 = scmp.lt.u32.totalorder %s601_s15, %s712_s0 }
  0x1e   : > { %p375_p6 = pnand %p374_p5, %p373_p4  ;;  %p379_p10 = scmp.lt.u32.totalorder %s377_s28, %s372_s23 }
  0x1f   : > { %p381_p13 = scmp.lt.u32.totalorder %s372_s23, %s601_s15 }
  0x20   : > { %p376_p7 = pneg %p375_p6  ;;  %p380_p11 = por %p379_p10, %p378_p3 }
  0x22   : > { %p382_p1 = por %p381_p13, %p380_p11 }
  0x24   : > { %p383_p2 = pnand %p382_p1, %p376_p7 }
  0x26   : > { %386 = shalt.err (!%p383_p2)
}
  0x27   : > { %s387_s26 = scalar_lea.vmem %s596_s3, 64  ;;  %s502_s2 = smov [#allocation2]  }
  0x28   : > { %p388_p4 = scmp.ne.s32.totalorder %s596_s3, %s387_s26  ;;  %s392_s4 = sshll.u32 %s502_s2, 4  ;;  %s393_s4 = int_to_ptr.vmem [resolvable:$false] %s392_s4 }
  0x29   : > { %s394_s5 = scalar_lea.vmem %s393_s4, 128  ;;  %p395_p9 = scmp.lt.s32.totalorder %s596_s3, %s393_s4 }
  0x2a   : > { %p390_p6 = pnand %p388_p4, %p374_p5  ;;  %p396_p3 = scmp.lt.s32.totalorder %s394_s5, %s387_s26 }
  0x2c   : > { %p391_p12 = pneg %p390_p6  ;;  %p397_p10 = por %p396_p3, %p395_p9 }
  0x2e   : > { %p398_p11 = pnand %p397_p10, %p391_p12 }
  0x30   : > { %401 = shalt.err (!%p398_p11)
}
  0x31   : > { %297 = dma.hbm_to_vmem [thread:$0]  (!%p605_p0), %s601_s15, 64, %s596_s3, %s104_s19  }
  0x32   : > { %p720_p1 = scmp.lt.s32.totalorder %s500_s13, 5  ;;  %p721_p2 = scmp.ge.s32.totalorder %s500_s13, 1 }
  0x34   : > { %p122_p5 = pnand %p721_p2, %p720_p1 }
  0x35   : > { %s641_s14 = sand.u32 (!%p122_p5), 1, %s476_s7  }
  0x36   : > { %125 = sbr.rel (%p122_p5) target bundleno = 135 (0x87), region = 24  ;;  %s283_s23 = sshll.u32 (!%p122_p5), %s641_s14, 2 }
  0x37   : > { %s128_s20 = scalar_lea.sflag (!%p122_p5), [#allocation3], %s641_s14  ;;  %s131_s18 = scalar_lea.vmem (!%p122_p5), [#allocation2], %s283_s23 }
  0x3d   : > { %463 = dma.done.wait (%p575_p8), %s128_s20, 64  }
  0x3e   : > { %465 = vsyncadd (%p575_p8), %s128_s20, 4294967232  ;;  %v150_v0 = vld [vmem:[%s131_s18] sm:$0xf]  ;;  %vm152_vm0 = vcmask 1043456   ;;  %s286_s21 = sshll.u32 %s488_s10, 1  ;;  %s149_s15 = scalar_lea.vmem [#allocation5], %s283_s23 }
  0x3f   : > { %v151_v1 = vmul.f32 0.4, %v150_v0  ;;  %s186_s3 = sadd.s32 %s484_s9, %s286_s21  ;;  %s190_s19 = sshll.u32 %s149_s15, 4  ;;  %s655_s19 = int_to_ptr.vmem [resolvable:$true] %s190_s19 }
  0x40   : > { %s287_s24 = sshll.u32 %s186_s3, 6  ;;  %s175_s10 = scalar_lea.sflag [#allocation4], %s641_s14 }
  0x41   : > { %v153_v2 = vsel %vm152_vm0, %v151_v1, -inf  ;;  %s660_s30 = scalar_lea.hbm %s713_s1, %s287_s24  ;;  %s402_s9 = scalar_lea.vmem %s655_s19, 64 }
  0x42   : > { %v154_v3 = vrot.slane %v153_v2, 4  ;;  %p403_p8 = scmp.ne.s32.totalorder %s655_s19, %s402_s9  ;;  %p722_p9 = scmp.ne.s32.totalorder %s717_s22, 0 }
  0x43   : > { %s503_s26 = smov [#allocation5]  }
  0x44   : > { %v155_v4 = vmax.f32 %v153_v2, %v154_v3  ;;  %p404_p12 = pnand %p403_p8, %p722_p9  ;;  %s406_s2 = sshll.u32 %s503_s26, 4  ;;  %s407_s2 = int_to_ptr.vmem [resolvable:$false] %s406_s2 }
  0x45   : > { %s408_s4 = scalar_lea.vmem %s407_s2, 128  ;;  %p409_p7 = scmp.lt.s32.totalorder %s655_s19, %s407_s2 }
  0x46   : > { %v156_v5 = vrot.slane %v155_v4, 2  ;;  %p405_p0 = pneg %p404_p12  ;;  %p410_p13 = scmp.lt.s32.totalorder %s408_s4, %s402_s9 }
  0x48   : > { %v157_v6 = vmax.f32 %v155_v4, %v156_v5  ;;  %p411_p4 = por %p410_p13, %p409_p7 }
  0x4a   : > { %v158_v7 = vrot.slane %v157_v6, 1  ;;  %p412_p6 = pnand %p411_p4, %p405_p0 }
  0x4c   : > { %v159_v8 = vmax.f32 %v157_v6, %v158_v7 }
  0x4e   : > { %v160_v9 = vsub.f32 %v151_v1, %v159_v8 }
  0x50   : > { %v161_v10 = vmul.f32 1.442695, %v160_v9 }
  0x52   : > { %368 = vpow2.f32 %v161_v10 }
  0x5c   : > { %v369_v11 = vpop.eup %368 }
  0x5d   : > { %v163_v12 = vsel %vm152_vm0, %v369_v11, 0.0 }
  0x5e   : > { %v164_v13 = vrot.slane %v163_v12, 4 }
  0x60   : > { %v165_v14 = vadd.f32 %v164_v13, %v163_v12 }
  0x62   : > { %v166_v15 = vrot.slane %v165_v14, 2 }
  0x64   : > { %v167_v16 = vadd.f32 %v166_v15, %v165_v14 }
  0x66   : > { %v168_v17 = vrot.slane %v167_v16, 1 }
  0x68   : > { %v169_v18 = vadd.f32 %v168_v17, %v167_v16 }
  0x6a   : > { %370 = vlog2.f32 %v169_v18 }
  0x74   : > { %v371_v19 = vpop.eup %370 }
  0x75   : > { %v171_v20 = vmul.f32 0.6931472, %v371_v19 }
  0x77   : > { %v172_v21 = vsub.f32 %v160_v9, %v171_v20 }
  0x79   : > { %173 = vst [vmem:[%s149_s15] sm:$0xf] %v172_v21 }
  0x7a   : > { %415 = shalt.err (!%p412_p6)
}
  0x7b   : > { %s416_s5 = scalar_lea.hbm %s660_s30, 64  ;;  %s420_s20 = scalar_lea.hbm %s713_s1, 256 }
  0x7c   : > { %p417_p3 = scmp.ne.s32.totalorder %s660_s30, %s416_s5  ;;  %p421_p1 = scmp.lt.u32.totalorder %s660_s30, %s713_s1 }
  0x7d   : > { %p422_p2 = scmp.lt.u32.totalorder %s420_s20, %s416_s5  ;;  %p424_p8 = scmp.lt.u32.totalorder %s416_s5, %s660_s30 }
  0x7e   : > { %p418_p10 = pnand %p417_p3, %p722_p9 }
  0x7f   : > { %p423_p5 = por %p422_p2, %p421_p1 }
  0x80   : > { %p419_p11 = pneg %p418_p10 }
  0x81   : > { %p425_p12 = por %p424_p8, %p423_p5 }
  0x83   : > { %p426_p0 = pnand %p425_p12, %p419_p11 }
  0x85   : > { %429 = shalt.err (!%p426_p0)
}
  0x86   : > { %292 = dma.vmem_to_hbm [thread:$0]  (%p722_p9), %s655_s19, 64, %s660_s30, %s175_s10  }
  0x87 PF: > { %p303_p7 = scmp.ge.s32.totalorder %s500_s13, 2  ;;  %s202_s3 = sand.u32 1, %s472_s6  }
  0x88   : > { %p723_p13 = scmp.ne.s32.totalorder %s718_s25, 0  ;;  %s203_s15 = scalar_lea.sflag [#allocation4], %s202_s3 }
  0x8a   : > { %p299_p4 = pnand %p303_p7, %p723_p13 }
  0x8c   : > { %467 = dma.done.wait (!%p299_p4), %s203_s15, 64  }
  0x8d   : > { %469 = vsyncadd (!%p299_p4), %s203_s15, 4294967232  ;;  %s17_s13 = sadd.s32 1, %s500_s13   ;;  %s724_s6 = smov %s476_s7 }
  0x8e   : > { %p14_p6 = scmp.ge.s32.totalorder %s17_s13, 6   ;;  %s725_s7 = smov %s480_s8 }
  0x8f   : > { %s726_s8 = smov %s592_s27  ;;  %s727_s9 = smov %s492_s11 }
  0x90   : > { %s728_s10 = smov %s496_s12  ;;  %s729_s11 = smov %s732_s16 }
  0x91   : > { %s730_s12 = smov %s736_s17  ;;  %16 = sbr.rel (!%p14_p6) target bundleno = 7 (0x7), region = 69 }
  0x98   :  { %208 = vsyncpa [#allocation3], 1 }
  0x99   :  { %210 = vsyncpa [#allocation3 + $0x1], 1 }
  0x9a   :  { %211 = vsyncpa [#allocation4], 1 }
  0x9b   :  { %213 = vsyncpa [#allocation4 + $0x1], 1 }

</bundles_post_ra>
